<compile_context>
chip_gen: v6e
topology: v6e:2x2x1
jax: 0.10.0
libtpu: 0.0.40
codegen_flags: <defaults>
</compile_context>

<pallas_src>
import functools
from collections import namedtuple

import jax
import jax.numpy as jnp
from jax.experimental import pallas as pl
from jax.experimental.pallas import tpu as pltpu


def _round_up(x, m):
    return ((x + m - 1) // m) * m


def _vmem_cap_bytes():
    """Per-TensorCore VMEM capacity (64 MiB on v7x, 128 MiB on v5e/v6e)."""
    try:
        info = pltpu.get_tpu_info()
        cap = getattr(info, "vmem_capacity_bytes", None)
        if cap:
            return int(cap)
    except Exception:
        pass
    return 64 << 20  # conservative fallback = v7x


# --------------------------------------------------------------------------------------
# Kernel
# --------------------------------------------------------------------------------------
def _dmf_kernel(u_ref, i_ref,
                uw1_ref, ub1_ref, uw2_ref, ub2_ref, uw3_ref, ub3_ref,
                iw1_ref, ib1_ref, iw2_ref, ib2_ref, iw3_ref, ib3_ref,
                out_ref, u_acc, i_acc, *, w1_resident, precision):
    f32 = jnp.float32
    kj = pl.program_id(1)

    @pl.when(kj == 0)
    def _init():
        u_acc[...] = jnp.zeros_like(u_acc)
        i_acc[...] = jnp.zeros_like(i_acc)

    # ---- layer 1 (K-tiled): acc (h1, tm) += W1_k (h1, tk) @ X^T_k (tk, tm) ----------
    # Interaction tiles arrive as int8; cast to the W1 dtype (bf16) right before the dot.
    x_u = u_ref[...].astype(uw1_ref.dtype)
    x_i = i_ref[...].astype(iw1_ref.dtype)
    if w1_resident:
        w_u = uw1_ref[kj]        # W1 resident in VMEM as (k_tiles, h1, tk); fetched once
        w_i = iw1_ref[kj]
    else:
        w_u = uw1_ref[0]         # W1 streamed as (1, h1, tk) tiles
        w_i = iw1_ref[0]
    u_acc[...] += jnp.dot(w_u, x_u, preferred_element_type=f32, precision=precision)
    i_acc[...] += jnp.dot(w_i, x_i, preferred_element_type=f32, precision=precision)

    @pl.when(kj == pl.num_programs(1) - 1)
    def _finish():
        # Layers 2/3 in (features, batch) layout: h = relu(W @ h + b[:, None]).
        # TODO(synk): dropout is inference-mode (identity); train-mode masking not implemented.
        u = jnp.maximum(u_acc[...] + ub1_ref[...], 0.0)
        u = jnp.maximum(jnp.dot(uw2_ref[...], u, preferred_element_type=f32,
                                precision=precision) + ub2_ref[...], 0.0)
        u = jnp.maximum(jnp.dot(uw3_ref[...], u, preferred_element_type=f32,
                                precision=precision) + ub3_ref[...], 0.0)

        it = jnp.maximum(i_acc[...] + ib1_ref[...], 0.0)
        it = jnp.maximum(jnp.dot(iw2_ref[...], it, preferred_element_type=f32,
                                 precision=precision) + ib2_ref[...], 0.0)
        it = jnp.maximum(jnp.dot(iw3_ref[...], it, preferred_element_type=f32,
                                 precision=precision) + ib3_ref[...], 0.0)

        # Fused L2-normalize + cosine similarity:
        #   sum(u_n * it_n) = sum(u*it) * rsqrt(max(|u|^2 * |it|^2, eps^2))
        # (F.normalize clamps each norm at 1e-12; we clamp the product -> 1e-24.)
        # Feature axis is the sublane axis -> the reductions directly yield a
        # lane-dense (1, tm) row; the store is a full unmasked vector store.
        s = jnp.sum(u * it, axis=0, keepdims=True)
        nu = jnp.sum(u * u, axis=0, keepdims=True)
        ni = jnp.sum(it * it, axis=0, keepdims=True)
        out_ref[...] = s * jax.lax.rsqrt(jnp.maximum(nu * ni, 1e-24))


# --------------------------------------------------------------------------------------
# Host-side planning / one-time preparation
# --------------------------------------------------------------------------------------
Plan = namedtuple("Plan", "B Ku Ki tm b_tiles b_pad k_tiles tk_u tk_i ku_pad ki_pad")


def plan_tiling(B, Ku, Ki, *, tm=512, tk=2048):
    tm = max(128, _round_up(tm, 128))
    if B > 128:
        # Keep >= 2 batch tiles so the "parallel" axis feeds both TensorCores on v7x.
        tm = min(tm, _round_up(pl.cdiv(B, 2), 128))
    b_tiles = pl.cdiv(B, tm)
    k_tiles = max(pl.cdiv(max(Ku, Ki), max(tk, 128)), 1)
    tk_u = _round_up(pl.cdiv(Ku, k_tiles), 128)
    tk_i = _round_up(pl.cdiv(Ki, k_tiles), 128)
    return Plan(B, Ku, Ki, tm, b_tiles, b_tiles * tm, k_tiles, tk_u, tk_i,
                tk_u * k_tiles, tk_i * k_tiles)


def prepare_interactions(user_vectors, item_vectors, plan, input_dtype=jnp.int8):
    """One-time setup (hoist out of the hot path): cast + transpose + zero-pad the
    interaction matrices to the (K_pad, B_pad) layout the kernel streams.
    int8 is exact for 0/1 implicit feedback; pass bf16/f32 for fractional ratings."""
    def prep(x, k_pad):
        x = jnp.asarray(x).astype(input_dtype).T                      # (K, B)
        return jnp.pad(x, ((0, k_pad - x.shape[0]), (0, plan.b_pad - x.shape[1])))
    return prep(user_vectors, plan.ku_pad), prep(item_vectors, plan.ki_pad)


def prepare_params(user_params, item_params, plan, layer1_weight_dtype=jnp.bfloat16):
    """Weights stay in PyTorch [out, in] layout (kernel computes W @ x).  Layer-1
    weights are zero-padded along K, cast to bf16 by default, and reshaped to
    (k_tiles, h1, tk) so the kernel can index K tiles with a leading-axis index.
    Biases become (h, 1) columns."""
    f32 = jnp.float32

    def tower(params, k_pad, k_tiles, tk):
        (w1, b1), (w2, b2), (w3, b3) = params
        h1 = w1.shape[0]
        w1 = jnp.pad(w1.astype(layer1_weight_dtype), ((0, 0), (0, k_pad - w1.shape[1])))
        w1 = w1.reshape(h1, k_tiles, tk).transpose(1, 0, 2)            # (k_tiles, h1, tk)
        return [w1, b1.reshape(-1, 1).astype(f32),
                w2.astype(f32), b2.reshape(-1, 1).astype(f32),
                w3.astype(f32), b3.reshape(-1, 1).astype(f32)]

    return (tower(user_params, plan.ku_pad, plan.k_tiles, plan.tk_u)
            + tower(item_params, plan.ki_pad, plan.k_tiles, plan.tk_i))


# --------------------------------------------------------------------------------------
# Forward
# --------------------------------------------------------------------------------------
def dmf_forward_prepared(uT, iT, weight_args, plan, *, w1_resident=None, precision=None):
    f32 = jnp.float32
    (uw1, ub1, uw2, ub2, uw3, ub3, iw1, ib1, iw2, ib2, iw3, ib3) = weight_args
    h1u, h1i = uw1.shape[1], iw1.shape[1]
    tm, tk_u, tk_i = plan.tm, plan.tk_u, plan.tk_i

    # ---- per-generation VMEM budget (v7x: 64 MiB/TC; v5e/v6e: 128 MiB) --------------
    usable = int(0.75 * _vmem_cap_bytes())
    in_b = jnp.dtype(uT.dtype).itemsize
    w1_b = jnp.dtype(uw1.dtype).itemsize
    small = 2 * sum(int(x.size) * jnp.dtype(x.dtype).itemsize
                    for x in (ub1, uw2, ub2, uw3, ub3, ib1, iw2, ib2, iw3, ib3))
    base = (2 * tm * (tk_u + tk_i) * in_b          # double-buffered streamed input tiles
            + tm * (h1u + h1i) * 4                 # f32 accumulators
            + 2 * tm * 4 + small + (4 << 20))      # output block + small weights + slack
    resident_need = base + 2 * (int(uw1.size) + int(iw1.size)) * w1_b
    streamed_need = base + 2 * (h1u * tk_u + h1i * tk_i) * w1_b
    if w1_resident is None:
        w1_resident = resident_need <= usable
    need = resident_need if w1_resident else streamed_need
    vmem_limit = int(min(usable, max(need, 32 << 20)))

    def full2d(x):   # small resident weights / biases: single full block, fetched once
        return pl.BlockSpec(x.shape, lambda bi, kj: (0, 0))

    if w1_resident:
        uw1_spec = pl.BlockSpec(uw1.shape, lambda bi, kj: (0, 0, 0))
        iw1_spec = pl.BlockSpec(iw1.shape, lambda bi, kj: (0, 0, 0))
    else:
        uw1_spec = pl.BlockSpec((1, h1u, tk_u), lambda bi, kj: (kj, 0, 0))
        iw1_spec = pl.BlockSpec((1, h1i, tk_i), lambda bi, kj: (kj, 0, 0))

    in_specs = [
        pl.BlockSpec((tk_u, tm), lambda bi, kj: (kj, bi)),   # user interactions (K, B) tile
        pl.BlockSpec((tk_i, tm), lambda bi, kj: (kj, bi)),   # item interactions (K, B) tile
        uw1_spec, full2d(ub1), full2d(uw2), full2d(ub2), full2d(uw3), full2d(ub3),
        iw1_spec, full2d(ib1), full2d(iw2), full2d(ib2), full2d(iw3), full2d(ib3),
    ]
    out_spec = pl.BlockSpec((1, tm), lambda bi, kj: (0, bi))   # lane-dense output row

    kernel = functools.partial(_dmf_kernel, w1_resident=w1_resident, precision=precision)

    out = pl.pallas_call(
        kernel,
        out_shape=jax.ShapeDtypeStruct((1, plan.b_pad), f32),
        grid_spec=pltpu.PrefetchScalarGridSpec(
            num_scalar_prefetch=0,
            grid=(plan.b_tiles, plan.k_tiles),
            in_specs=in_specs,
            out_specs=out_spec,
            scratch_shapes=[pltpu.VMEM((h1u, tm), f32),
                            pltpu.VMEM((h1i, tm), f32)],
        ),
        compiler_params=pltpu.CompilerParams(
            dimension_semantics=("parallel", "arbitrary"),
            vmem_limit_bytes=vmem_limit,
        ),
    )(uT, iT, uw1, ub1, uw2, ub2, uw3, ub3, iw1, ib1, iw2, ib2, iw3, ib3)

    return out[0, :plan.B]                          # -> [B], matches torch output


def dmf_forward(user_vectors, item_vectors, user_params, item_params, *,
                tm=512, tk=2048, input_dtype=jnp.int8,
                layer1_weight_dtype=jnp.bfloat16, w1_resident=None, precision=None):
    """Single-call convenience path.  NOTE: this repeats the cast/transpose/pad setup
    over the interaction matrices; for repeated calls, run plan_tiling +
    prepare_interactions + prepare_params once and call dmf_forward_prepared."""
    B, Ku = user_vectors.shape
    _, Ki = item_vectors.shape
    plan = plan_tiling(B, Ku, Ki, tm=tm, tk=tk)
    uT, iT = prepare_interactions(user_vectors, item_vectors, plan, input_dtype=input_dtype)
    weights = prepare_params(user_params, item_params, plan,
                             layer1_weight_dtype=layer1_weight_dtype)
    return dmf_forward_prepared(uT, iT, weights, plan,
                                w1_resident=w1_resident, precision=precision)


# --------------------------------------------------------------------------------------
# Reference + demo
# --------------------------------------------------------------------------------------
def _xavier_normal(key, out_dim, in_dim):
    std = (2.0 / (in_dim + out_dim)) ** 0.5
    return std * jax.random.normal(key, (out_dim, in_dim), dtype=jnp.float32)


def make_params(key, input_dim, layer_dims):
    params = []
    in_dim = input_dim
    for dim in layer_dims:
        key, sub = jax.random.split(key)
        params.append((_xavier_normal(sub, dim, in_dim), jnp.zeros((dim,), jnp.float32)))
        in_dim = dim
    return key, params


def reference_forward(user_vectors, item_vectors, user_params, item_params):
    """Plain-JAX reference replicating the PyTorch forward (eval mode)."""
    u = user_vectors
    for (W, b) in user_params:
        u = jnp.maximum(u @ W.T + b, 0.0)
    it = item_vectors
    for (W, b) in item_params:
        it = jnp.maximum(it @ W.T + b, 0.0)
    u = u / jnp.maximum(jnp.linalg.norm(u, axis=1, keepdims=True), 1e-12)
    it = it / jnp.maximum(jnp.linalg.norm(it, axis=1, keepdims=True), 1e-12)
    return jnp.sum(u * it, axis=1)


if __name__ == "__main__":
    # Small synthetic configuration, sized so the test exercises multiple batch tiles
    # and multiple K (reduction) tiles of the grid.
    num_users, num_items = 220, 300
    user_layers = [32, 16, 8]
    item_layers = [32, 16, 8]
    B = 200

    key = jax.random.PRNGKey(0)
    key, user_params = make_params(key, num_items, user_layers)
    key, item_params = make_params(key, num_users, item_layers)

    key, ku_key, ki_key = jax.random.split(key, 3)
    # Binary interaction vectors (rows/cols of an implicit-feedback matrix).
    user_vectors = (jax.random.uniform(ku_key, (B, num_items)) < 0.3).astype(jnp.float32)
    item_vectors = (jax.random.uniform(ki_key, (B, num_users)) < 0.3).astype(jnp.float32)

    ref = reference_forward(user_vectors, item_vectors, user_params, item_params)

    # One-time setup (hoisted out of the per-call path).  Small tiles here so the toy
    # shapes hit grid=(2, 3); at real DMF sizes use the defaults (tm=512, tk=2048).
    plan = plan_tiling(B, num_items, num_users, tm=128, tk=128)
    uT, iT = prepare_interactions(user_vectors, item_vectors, plan)
    weights = prepare_params(user_params, item_params, plan)

    # Exercise both layer-1 weight paths: fully VMEM-resident and K-streamed.
    for resident in (True, False):
        pred = dmf_forward_prepared(uT, iT, weights, plan, w1_resident=resident)
        pred = jax.block_until_ready(pred)
        assert pred.shape == (B,)
        # Tolerance covers bf16 layer-1 weights + default MXU precision + accumulation
        # order differences vs the f32 reference.
        assert jnp.allclose(pred, ref, atol=1e-2, rtol=1e-2), (resident, pred, ref)

    # Convenience single-call path (does the prep per call).
    pred2 = jax.block_until_ready(
        dmf_forward(user_vectors, item_vectors, user_params, item_params, tm=128, tk=128))
    assert jnp.allclose(pred2, ref, atol=1e-2, rtol=1e-2)

    print("KERNEL_OK")
</pallas_src>

<mosaic_0001>
module attributes {stable_mosaic.version = 11 : i64} {
  func.func @_dmf_kernel(%arg0: i32, %arg1: i32, %arg2: memref<128x128xi8, #tpu.memory_space<vmem>>, %arg3: memref<128x128xi8, #tpu.memory_space<vmem>>, %arg4: memref<3x32x128xbf16, #tpu.memory_space<vmem>>, %arg5: memref<32x1xf32, #tpu.memory_space<vmem>>, %arg6: memref<16x32xf32, #tpu.memory_space<vmem>>, %arg7: memref<16x1xf32, #tpu.memory_space<vmem>>, %arg8: memref<8x16xf32, #tpu.memory_space<vmem>>, %arg9: memref<8x1xf32, #tpu.memory_space<vmem>>, %arg10: memref<3x32x128xbf16, #tpu.memory_space<vmem>>, %arg11: memref<32x1xf32, #tpu.memory_space<vmem>>, %arg12: memref<16x32xf32, #tpu.memory_space<vmem>>, %arg13: memref<16x1xf32, #tpu.memory_space<vmem>>, %arg14: memref<8x16xf32, #tpu.memory_space<vmem>>, %arg15: memref<8x1xf32, #tpu.memory_space<vmem>>, %arg16: memref<1x128xf32, #tpu.memory_space<vmem>>, %arg17: memref<32x128xf32, #tpu.memory_space<vmem>>, %arg18: memref<32x128xf32, #tpu.memory_space<vmem>>) attributes {dimension_semantics = [#tpu.dimension_semantics<parallel>, #tpu.dimension_semantics<arbitrary>], iteration_bounds = array<i64: 2, 3>, scalar_prefetch = 0 : i64, scratch_operands = 2 : i64, tpu.core_type = #tpu.core_type<tc>, window_params = [{transform_indices = @transform_0, window_bounds = array<i64: 128, 128>}, {transform_indices = @transform_1, window_bounds = array<i64: 128, 128>}, {pipeline_mode = #tpu.pipeline_mode<synchronous>, transform_indices = @transform_2, window_bounds = array<i64: 3, 32, 128>}, {pipeline_mode = #tpu.pipeline_mode<synchronous>, transform_indices = @transform_3, window_bounds = array<i64: 32, 1>}, {pipeline_mode = #tpu.pipeline_mode<synchronous>, transform_indices = @transform_4, window_bounds = array<i64: 16, 32>}, {pipeline_mode = #tpu.pipeline_mode<synchronous>, transform_indices = @transform_5, window_bounds = array<i64: 16, 1>}, {pipeline_mode = #tpu.pipeline_mode<synchronous>, transform_indices = @transform_6, window_bounds = array<i64: 8, 16>}, {pipeline_mode = #tpu.pipeline_mode<synchronous>, transform_indices = @transform_7, window_bounds = array<i64: 8, 1>}, {pipeline_mode = #tpu.pipeline_mode<synchronous>, transform_indices = @transform_8, window_bounds = array<i64: 3, 32, 128>}, {pipeline_mode = #tpu.pipeline_mode<synchronous>, transform_indices = @transform_9, window_bounds = array<i64: 32, 1>}, {pipeline_mode = #tpu.pipeline_mode<synchronous>, transform_indices = @transform_10, window_bounds = array<i64: 16, 32>}, {pipeline_mode = #tpu.pipeline_mode<synchronous>, transform_indices = @transform_11, window_bounds = array<i64: 16, 1>}, {pipeline_mode = #tpu.pipeline_mode<synchronous>, transform_indices = @transform_12, window_bounds = array<i64: 8, 16>}, {pipeline_mode = #tpu.pipeline_mode<synchronous>, transform_indices = @transform_13, window_bounds = array<i64: 8, 1>}, {transform_indices = @transform_14, window_bounds = array<i64: 1, 128>}]} {
    %c0_i32 = arith.constant 0 : i32
    %0 = arith.cmpi eq, %arg1, %c0_i32 : i32
    %1 = arith.extui %0 : i1 to i32
    %c0_i32_0 = arith.constant 0 : i32
    %2 = arith.cmpi ne, %1, %c0_i32_0 : i32
    scf.if %2 {
      %cst_18 = arith.constant 0.000000e+00 : f32
      %24 = vector.broadcast %cst_18 : f32 to vector<32x128xf32>
      %c0_19 = arith.constant 0 : index
      %c0_20 = arith.constant 0 : index
      %25 = vector.load %arg17[%c0_19, %c0_20] : memref<32x128xf32, #tpu.memory_space<vmem>>, vector<32x128xf32>
      tpu.vector_store %arg17[%c0_19, %c0_20], %24 {strides = array<i32>} : memref<32x128xf32, #tpu.memory_space<vmem>>, vector<32x128xf32>,
      %cst_21 = arith.constant 0.000000e+00 : f32
      %26 = vector.broadcast %cst_21 : f32 to vector<32x128xf32>
      %c0_22 = arith.constant 0 : index
      %c0_23 = arith.constant 0 : index
      %27 = vector.load %arg18[%c0_22, %c0_23] : memref<32x128xf32, #tpu.memory_space<vmem>>, vector<32x128xf32>
      tpu.vector_store %arg18[%c0_22, %c0_23], %26 {strides = array<i32>} : memref<32x128xf32, #tpu.memory_space<vmem>>, vector<32x128xf32>,
    } else {
    }
    %c0 = arith.constant 0 : index
    %c0_1 = arith.constant 0 : index
    %3 = vector.load %arg2[%c0, %c0_1] : memref<128x128xi8, #tpu.memory_space<vmem>>, vector<128x128xi8>
    %4 = arith.sitofp %3 : vector<128x128xi8> to vector<128x128xbf16>
    %c0_2 = arith.constant 0 : index
    %c0_3 = arith.constant 0 : index
    %5 = vector.load %arg3[%c0_2, %c0_3] : memref<128x128xi8, #tpu.memory_space<vmem>>, vector<128x128xi8>
    %6 = arith.sitofp %5 : vector<128x128xi8> to vector<128x128xbf16>
    %7 = arith.index_cast %arg1 : i32 to index
    %c0_4 = arith.constant 0 : index
    %c0_5 = arith.constant 0 : index
    %8 = vector.load %arg4[%7, %c0_4, %c0_5] : memref<3x32x128xbf16, #tpu.memory_space<vmem>>, vector<1x32x128xbf16>
    %9 = vector.shape_cast %8 : vector<1x32x128xbf16> to vector<32x128xbf16>
    %10 = arith.index_cast %arg1 : i32 to index
    %c0_6 = arith.constant 0 : index
    %c0_7 = arith.constant 0 : index
    %11 = vector.load %arg10[%10, %c0_6, %c0_7] : memref<3x32x128xbf16, #tpu.memory_space<vmem>>, vector<1x32x128xbf16>
    %12 = vector.shape_cast %11 : vector<1x32x128xbf16> to vector<32x128xbf16>
    %c0_8 = arith.constant 0 : index
    %c0_9 = arith.constant 0 : index
    %13 = vector.load %arg17[%c0_8, %c0_9] : memref<32x128xf32, #tpu.memory_space<vmem>>, vector<32x128xf32>
    %cst = arith.constant dense<0.000000e+00> : vector<32x128xf32>
    %14 = tpu.matmul %9, %4, %cst {dimension_numbers = #tpu.dot_dimension_numbers<[1], [0], [0], [1], [0, 0, 1, 1], [], []>} : vector<32x128xbf16>, vector<128x128xbf16>, vector<32x128xf32> -> vector<32x128xf32>
    %15 = arith.addf %13, %14 : vector<32x128xf32>
    %c0_10 = arith.constant 0 : index
    %c0_11 = arith.constant 0 : index
    %16 = vector.load %arg17[%c0_10, %c0_11] : memref<32x128xf32, #tpu.memory_space<vmem>>, vector<32x128xf32>
    tpu.vector_store %arg17[%c0_10, %c0_11], %15 {strides = array<i32>} : memref<32x128xf32, #tpu.memory_space<vmem>>, vector<32x128xf32>,
    %c0_12 = arith.constant 0 : index
    %c0_13 = arith.constant 0 : index
    %17 = vector.load %arg18[%c0_12, %c0_13] : memref<32x128xf32, #tpu.memory_space<vmem>>, vector<32x128xf32>
    %cst_14 = arith.constant dense<0.000000e+00> : vector<32x128xf32>
    %18 = tpu.matmul %12, %6, %cst_14 {dimension_numbers = #tpu.dot_dimension_numbers<[1], [0], [0], [1], [0, 0, 1, 1], [], []>} : vector<32x128xbf16>, vector<128x128xbf16>, vector<32x128xf32> -> vector<32x128xf32>
    %19 = arith.addf %17, %18 : vector<32x128xf32>
    %c0_15 = arith.constant 0 : index
    %c0_16 = arith.constant 0 : index
    %20 = vector.load %arg18[%c0_15, %c0_16] : memref<32x128xf32, #tpu.memory_space<vmem>>, vector<32x128xf32>
    tpu.vector_store %arg18[%c0_15, %c0_16], %19 {strides = array<i32>} : memref<32x128xf32, #tpu.memory_space<vmem>>, vector<32x128xf32>,
    %c2_i32 = arith.constant 2 : i32
    %21 = arith.cmpi eq, %arg1, %c2_i32 : i32
    %22 = arith.extui %21 : i1 to i32
    %c0_i32_17 = arith.constant 0 : i32
    %23 = arith.cmpi ne, %22, %c0_i32_17 : i32
    scf.if %23 {
      %c0_18 = arith.constant 0 : index
      %c0_19 = arith.constant 0 : index
      %24 = vector.load %arg17[%c0_18, %c0_19] : memref<32x128xf32, #tpu.memory_space<vmem>>, vector<32x128xf32>
      %c0_20 = arith.constant 0 : index
      %c0_21 = arith.constant 0 : index
      %25 = vector.load %arg5[%c0_20, %c0_21] : memref<32x1xf32, #tpu.memory_space<vmem>>, vector<32x1xf32>
      %26 = vector.broadcast %25 : vector<32x1xf32> to vector<32x128xf32>
      %27 = arith.addf %24, %26 : vector<32x128xf32>
      %cst_22 = arith.constant 0.000000e+00 : f32
      %28 = vector.broadcast %cst_22 : f32 to vector<32x128xf32>
      %29 = arith.maximumf %27, %28 : vector<32x128xf32>
      %c0_23 = arith.constant 0 : index
      %c0_24 = arith.constant 0 : index
      %30 = vector.load %arg6[%c0_23, %c0_24] : memref<16x32xf32, #tpu.memory_space<vmem>>, vector<16x32xf32>
      %cst_25 = arith.constant dense<0.000000e+00> : vector<16x128xf32>
      %31 = tpu.matmul %30, %29, %cst_25 {dimension_numbers = #tpu.dot_dimension_numbers<[1], [0], [0], [1], [0, 0, 1, 1], [], []>} : vector<16x32xf32>, vector<32x128xf32>, vector<16x128xf32> -> vector<16x128xf32>
      %c0_26 = arith.constant 0 : index
      %c0_27 = arith.constant 0 : index
      %32 = vector.load %arg7[%c0_26, %c0_27] : memref<16x1xf32, #tpu.memory_space<vmem>>, vector<16x1xf32>
      %33 = vector.broadcast %32 : vector<16x1xf32> to vector<16x128xf32>
      %34 = arith.addf %31, %33 : vector<16x128xf32>
      %cst_28 = arith.constant 0.000000e+00 : f32
      %35 = vector.broadcast %cst_28 : f32 to vector<16x128xf32>
      %36 = arith.maximumf %34, %35 : vector<16x128xf32>
      %c0_29 = arith.constant 0 : index
      %c0_30 = arith.constant 0 : index
      %37 = vector.load %arg8[%c0_29, %c0_30] : memref<8x16xf32, #tpu.memory_space<vmem>>, vector<8x16xf32>
      %cst_31 = arith.constant dense<0.000000e+00> : vector<8x128xf32>
      %38 = tpu.matmul %37, %36, %cst_31 {dimension_numbers = #tpu.dot_dimension_numbers<[1], [0], [0], [1], [0, 0, 1, 1], [], []>} : vector<8x16xf32>, vector<16x128xf32>, vector<8x128xf32> -> vector<8x128xf32>
      %c0_32 = arith.constant 0 : index
      %c0_33 = arith.constant 0 : index
      %39 = vector.load %arg9[%c0_32, %c0_33] : memref<8x1xf32, #tpu.memory_space<vmem>>, vector<8x1xf32>
      %40 = vector.broadcast %39 : vector<8x1xf32> to vector<8x128xf32>
      %41 = arith.addf %38, %40 : vector<8x128xf32>
      %cst_34 = arith.constant 0.000000e+00 : f32
      %42 = vector.broadcast %cst_34 : f32 to vector<8x128xf32>
      %43 = arith.maximumf %41, %42 : vector<8x128xf32>
      %c0_35 = arith.constant 0 : index
      %c0_36 = arith.constant 0 : index
      %44 = vector.load %arg18[%c0_35, %c0_36] : memref<32x128xf32, #tpu.memory_space<vmem>>, vector<32x128xf32>
      %c0_37 = arith.constant 0 : index
      %c0_38 = arith.constant 0 : index
      %45 = vector.load %arg11[%c0_37, %c0_38] : memref<32x1xf32, #tpu.memory_space<vmem>>, vector<32x1xf32>
      %46 = vector.broadcast %45 : vector<32x1xf32> to vector<32x128xf32>
      %47 = arith.addf %44, %46 : vector<32x128xf32>
      %cst_39 = arith.constant 0.000000e+00 : f32
      %48 = vector.broadcast %cst_39 : f32 to vector<32x128xf32>
      %49 = arith.maximumf %47, %48 : vector<32x128xf32>
      %c0_40 = arith.constant 0 : index
      %c0_41 = arith.constant 0 : index
      %50 = vector.load %arg12[%c0_40, %c0_41] : memref<16x32xf32, #tpu.memory_space<vmem>>, vector<16x32xf32>
      %cst_42 = arith.constant dense<0.000000e+00> : vector<16x128xf32>
      %51 = tpu.matmul %50, %49, %cst_42 {dimension_numbers = #tpu.dot_dimension_numbers<[1], [0], [0], [1], [0, 0, 1, 1], [], []>} : vector<16x32xf32>, vector<32x128xf32>, vector<16x128xf32> -> vector<16x128xf32>
      %c0_43 = arith.constant 0 : index
      %c0_44 = arith.constant 0 : index
      %52 = vector.load %arg13[%c0_43, %c0_44] : memref<16x1xf32, #tpu.memory_space<vmem>>, vector<16x1xf32>
      %53 = vector.broadcast %52 : vector<16x1xf32> to vector<16x128xf32>
      %54 = arith.addf %51, %53 : vector<16x128xf32>
      %cst_45 = arith.constant 0.000000e+00 : f32
      %55 = vector.broadcast %cst_45 : f32 to vector<16x128xf32>
      %56 = arith.maximumf %54, %55 : vector<16x128xf32>
      %c0_46 = arith.constant 0 : index
      %c0_47 = arith.constant 0 : index
      %57 = vector.load %arg14[%c0_46, %c0_47] : memref<8x16xf32, #tpu.memory_space<vmem>>, vector<8x16xf32>
      %cst_48 = arith.constant dense<0.000000e+00> : vector<8x128xf32>
      %58 = tpu.matmul %57, %56, %cst_48 {dimension_numbers = #tpu.dot_dimension_numbers<[1], [0], [0], [1], [0, 0, 1, 1], [], []>} : vector<8x16xf32>, vector<16x128xf32>, vector<8x128xf32> -> vector<8x128xf32>
      %c0_49 = arith.constant 0 : index
      %c0_50 = arith.constant 0 : index
      %59 = vector.load %arg15[%c0_49, %c0_50] : memref<8x1xf32, #tpu.memory_space<vmem>>, vector<8x1xf32>
      %60 = vector.broadcast %59 : vector<8x1xf32> to vector<8x128xf32>
      %61 = arith.addf %58, %60 : vector<8x128xf32>
      %cst_51 = arith.constant 0.000000e+00 : f32
      %62 = vector.broadcast %cst_51 : f32 to vector<8x128xf32>
      %63 = arith.maximumf %61, %62 : vector<8x128xf32>
      %64 = arith.mulf %43, %63 : vector<8x128xf32>
      %cst_52 = arith.constant dense<0.000000e+00> : vector<128xf32>
      %65 = vector.multi_reduction <add>, %64, %cst_52 [0] : vector<8x128xf32> to vector<128xf32>
      %66 = vector.shape_cast %65 : vector<128xf32> to vector<1x128xf32>
      %67 = arith.mulf %43, %43 : vector<8x128xf32>
      %cst_53 = arith.constant dense<0.000000e+00> : vector<128xf32>
      %68 = vector.multi_reduction <add>, %67, %cst_53 [0] : vector<8x128xf32> to vector<128xf32>
      %69 = vector.shape_cast %68 : vector<128xf32> to vector<1x128xf32>
      %70 = arith.mulf %63, %63 : vector<8x128xf32>
      %cst_54 = arith.constant dense<0.000000e+00> : vector<128xf32>
      %71 = vector.multi_reduction <add>, %70, %cst_54 [0] : vector<8x128xf32> to vector<128xf32>
      %72 = vector.shape_cast %71 : vector<128xf32> to vector<1x128xf32>
      %73 = arith.mulf %69, %72 : vector<1x128xf32>
      %cst_55 = arith.constant 1.000000e-24 : f32
      %74 = vector.broadcast %cst_55 : f32 to vector<1x128xf32>
      %75 = arith.maximumf %73, %74 : vector<1x128xf32>
      %76 = math.rsqrt %75 : vector<1x128xf32>
      %77 = arith.mulf %66, %76 : vector<1x128xf32>
      %c0_56 = arith.constant 0 : index
      %c0_57 = arith.constant 0 : index
      %78 = vector.load %arg16[%c0_56, %c0_57] : memref<1x128xf32, #tpu.memory_space<vmem>>, vector<1x128xf32>
      tpu.vector_store %arg16[%c0_56, %c0_57], %77 {strides = array<i32>} : memref<1x128xf32, #tpu.memory_space<vmem>>, vector<1x128xf32>,
    } else {
    }
    return
  }
  func.func @transform_0(%arg0: i32, %arg1: i32) -> (i32, i32) {
    %c0_i32 = arith.constant 0 : i32
    return %arg1, %arg0 : i32, i32
  }
  func.func @transform_1(%arg0: i32, %arg1: i32) -> (i32, i32) {
    %c0_i32 = arith.constant 0 : i32
    return %arg1, %arg0 : i32, i32
  }
  func.func @transform_2(%arg0: i32, %arg1: i32) -> (i32, i32, i32) {
    %c0_i32 = arith.constant 0 : i32
    %c0_i32_0 = arith.constant 0 : i32
    %c0_i32_1 = arith.constant 0 : i32
    %c0_i32_2 = arith.constant 0 : i32
    return %c0_i32, %c0_i32_0, %c0_i32_1 : i32, i32, i32
  }
  func.func @transform_3(%arg0: i32, %arg1: i32) -> (i32, i32) {
    %c0_i32 = arith.constant 0 : i32
    %c0_i32_0 = arith.constant 0 : i32
    %c0_i32_1 = arith.constant 0 : i32
    return %c0_i32, %c0_i32_0 : i32, i32
  }
  func.func @transform_4(%arg0: i32, %arg1: i32) -> (i32, i32) {
    %c0_i32 = arith.constant 0 : i32
    %c0_i32_0 = arith.constant 0 : i32
    %c0_i32_1 = arith.constant 0 : i32
    return %c0_i32, %c0_i32_0 : i32, i32
  }
  func.func @transform_5(%arg0: i32, %arg1: i32) -> (i32, i32) {
    %c0_i32 = arith.constant 0 : i32
    %c0_i32_0 = arith.constant 0 : i32
    %c0_i32_1 = arith.constant 0 : i32
    return %c0_i32, %c0_i32_0 : i32, i32
  }
  func.func @transform_6(%arg0: i32, %arg1: i32) -> (i32, i32) {
    %c0_i32 = arith.constant 0 : i32
    %c0_i32_0 = arith.constant 0 : i32
    %c0_i32_1 = arith.constant 0 : i32
    return %c0_i32, %c0_i32_0 : i32, i32
  }
  func.func @transform_7(%arg0: i32, %arg1: i32) -> (i32, i32) {
    %c0_i32 = arith.constant 0 : i32
    %c0_i32_0 = arith.constant 0 : i32
    %c0_i32_1 = arith.constant 0 : i32
    return %c0_i32, %c0_i32_0 : i32, i32
  }
  func.func @transform_8(%arg0: i32, %arg1: i32) -> (i32, i32, i32) {
    %c0_i32 = arith.constant 0 : i32
    %c0_i32_0 = arith.constant 0 : i32
    %c0_i32_1 = arith.constant 0 : i32
    %c0_i32_2 = arith.constant 0 : i32
    return %c0_i32, %c0_i32_0, %c0_i32_1 : i32, i32, i32
  }
  func.func @transform_9(%arg0: i32, %arg1: i32) -> (i32, i32) {
    %c0_i32 = arith.constant 0 : i32
    %c0_i32_0 = arith.constant 0 : i32
    %c0_i32_1 = arith.constant 0 : i32
    return %c0_i32, %c0_i32_0 : i32, i32
  }
  func.func @transform_10(%arg0: i32, %arg1: i32) -> (i32, i32) {
    %c0_i32 = arith.constant 0 : i32
    %c0_i32_0 = arith.constant 0 : i32
    %c0_i32_1 = arith.constant 0 : i32
    return %c0_i32, %c0_i32_0 : i32, i32
  }
  func.func @transform_11(%arg0: i32, %arg1: i32) -> (i32, i32) {
    %c0_i32 = arith.constant 0 : i32
    %c0_i32_0 = arith.constant 0 : i32
    %c0_i32_1 = arith.constant 0 : i32
    return %c0_i32, %c0_i32_0 : i32, i32
  }
  func.func @transform_12(%arg0: i32, %arg1: i32) -> (i32, i32) {
    %c0_i32 = arith.constant 0 : i32
    %c0_i32_0 = arith.constant 0 : i32
    %c0_i32_1 = arith.constant 0 : i32
    return %c0_i32, %c0_i32_0 : i32, i32
  }
  func.func @transform_13(%arg0: i32, %arg1: i32) -> (i32, i32) {
    %c0_i32 = arith.constant 0 : i32
    %c0_i32_0 = arith.constant 0 : i32
    %c0_i32_1 = arith.constant 0 : i32
    return %c0_i32, %c0_i32_0 : i32, i32
  }
  func.func @transform_14(%arg0: i32, %arg1: i32) -> (i32, i32) {
    %c0_i32 = arith.constant 0 : i32
    %c0_i32_0 = arith.constant 0 : i32
    return %c0_i32, %arg0 : i32, i32
  }
}

</mosaic_0001>

<bundles_post_ra>
// kernel: tpu_custom_call.1
= control target key start
LH: loop header
LB: loop body
LE: loop exit
PB: predicated region body
PF: predicated region fallthrough
CT: control target
= control target key end

     0   :  { %s2266_s0 = inlined_call_operand.hbm [shape: s8[384,256], index: 0, kind: input, shape index: {}]   ;;  %s2267_s1 = inlined_call_operand.hbm [shape: s8[384,256], index: 1, kind: input, shape index: {}]   ;;  %s2268_s2 = inlined_call_operand.vmem [shape: bf16[3,32,128], index: 2, kind: input, shape index: {}]   ;;  %s2269_s3 = inlined_call_operand.vmem [shape: f32[32,1], index: 3, kind: input, shape index: {}]   ;;  %s2270_s4 = inlined_call_operand.vmem [shape: f32[16,32], index: 4, kind: input, shape index: {}]   ;;  %s2271_s5 = inlined_call_operand.vmem [shape: f32[16,1], index: 5, kind: input, shape index: {}]   ;;  %s2272_s6 = inlined_call_operand.hbm [shape: f32[8,16], index: 6, kind: input, shape index: {}]   ;;  %s2273_s7 = inlined_call_operand.vmem [shape: f32[8,1], index: 7, kind: input, shape index: {}]   ;;  %s2274_s8 = inlined_call_operand.vmem [shape: bf16[3,32,128], index: 8, kind: input, shape index: {}]   ;;  %s2275_s9 = inlined_call_operand.vmem [shape: f32[32,1], index: 9, kind: input, shape index: {}]   ;;  %s2276_s10 = inlined_call_operand.vmem [shape: f32[16,32], index: 10, kind: input, shape index: {}]   ;;  %s2277_s11 = inlined_call_operand.vmem [shape: f32[16,1], index: 11, kind: input, shape index: {}]   ;;  %s2278_s12 = inlined_call_operand.vmem [shape: f32[8,16], index: 12, kind: input, shape index: {}]   ;;  %s2279_s13 = inlined_call_operand.vmem [shape: f32[8,1], index: 13, kind: input, shape index: {}]   ;;  %s2280_s14 = inlined_call_operand.hbm [shape: f32[1,256], index: 14, kind: output, shape index: {}]  }
   0x1   :  { %2299 = sst [smem:[#allocation24_spill]] %s2266_s0 }
   0x2   :  { %2300 = sst [smem:[#allocation25_spill]] %s2268_s2 }
   0x3   :  { %2301 = sst [smem:[#allocation26_spill]] %s2269_s3 }
   0x4   :  { %2302 = sst [smem:[#allocation27_spill]] %s2270_s4 }
   0x5   :  { %2303 = sst [smem:[#allocation28_spill]] %s2271_s5 }
   0x6   :  { %2304 = sst [smem:[#allocation29_spill]] %s2272_s6 }
   0x7   :  { %2305 = sst [smem:[#allocation30_spill]] %s2273_s7 }
   0x8   :  { %2306 = sst [smem:[#allocation31_spill]] %s2274_s8 }
   0x9   :  { %2307 = sst [smem:[#allocation32_spill]] %s2275_s9 }
   0xa   :  { %2308 = sst [smem:[#allocation33_spill]] %s2276_s10 }
   0xb   :  { %2309 = sst [smem:[#allocation34_spill]] %s2277_s11 }
   0xc   :  { %2310 = sst [smem:[#allocation35_spill]] %s2278_s12 }
   0xd   :  { %2311 = sst [smem:[#allocation36_spill]] %s2279_s13 }
   0xe   :  { %2312 = sst [smem:[#allocation37_spill]] %s2280_s14 }
   0xf   :  { %19 = vsyncpa [#allocation5], 0 }
  0x10   :  { %21 = vsyncpa [#allocation5 + $0x1], 0 }
  0x11   :  { %22 = vsyncpa [#allocation8], 0 }
  0x12   :  { %24 = vsyncpa [#allocation8 + $0x1], 0 }
  0x13   :  { %25 = vsyncpa [#allocation6], 0 }
  0x14   :  { %27 = vsyncpa [#allocation6 + $0x1], 0  ;;  %s1929_s29 = smov 0   ;;  %s1931_s30 = smov 0  }
  0x15   :  { %s1933_s15 = smov 0   ;;  %s1935_s16 = smov 0  }
  0x16   :  { %s1937_s17 = smov 0   ;;  %s1939_s18 = smov 0  }
  0x17   :  { %s1941_s19 = smov 0   ;;  %s1943_s20 = smov 0  }
  0x18   :  { %s1945_s21 = smov 0   ;;  %s1947_s22 = smov 0  }
  0x19   :  { %s1949_s23 = smov 0  }
  0x1a LB: > { %2313 = sst [smem:[#allocation15_spill]] %s1801_s29  ;;  %s1983_s24 = sadd.s32 4294967295, %s1841_s23   ;;  %s1841_s23 = sphi %s1949_s23, %s33_s23   ;;  %s1837_s22 = sphi %s1947_s22, %s2359_s22   ;;  %s1833_s21 = sphi %s1945_s21, %s2358_s21   ;;  %s1829_s20 = sphi %s1943_s20, %s2357_s20   ;;  %s1825_s19 = sphi %s1941_s19, %s2356_s19   ;;  %s1821_s18 = sphi %s1939_s18, %s2365_s18   ;;  %s1817_s17 = sphi %s1937_s17, %s2364_s17   ;;  %s1813_s16 = sphi %s1935_s16, %s2363_s16   ;;  %s1809_s15 = sphi %s1933_s15, %s2362_s15   ;;  %s1805_s30 = sphi %s1931_s30, %s2361_s30   ;;  %s1801_s29 = sphi %s1929_s29, %s2360_s29  }
  0x1b   : > { %2314 = sst [smem:[#allocation16_spill]] %s1829_s20  ;;  %s1346_s25 = sadd.s32 4294967294, %s1841_s23  }
  0x1c   : > { %2315 = sst [smem:[#allocation17_spill]] %s1833_s21  ;;  %p61_p0 = scmp.ne.s32.totalorder %s1821_s18, %s1817_s17 }
  0x1d   : > { %2316 = sst [smem:[#allocation18_spill]] %s1837_s22  ;;  %p62_p1 = scmp.eq.s32.totalorder %s1841_s23, 0 }
  0x1e   : > { %p67_p2 = scmp.ne.s32.totalorder %s1817_s17, %s1813_s16  ;;  %p68_p3 = scmp.eq.s32.totalorder %s1983_s24, 0 }
  0x1f   : > { %p1993_p4 = por %p62_p1, %p61_p0  ;;  %p370_p5 = scmp.ne.s32.totalorder %s1809_s15, %s1805_s30 }
  0x20   : > { %p2001_p6 = por %p68_p3, %p67_p2  ;;  %p371_p7 = scmp.eq.s32.totalorder %s1983_s24, 5 }
  0x21   : > { %p376_p8 = scmp.ne.s32.totalorder %s1805_s30, %s1801_s29  ;;  %p377_p9 = scmp.eq.s32.totalorder %s1346_s25, 5 }
  0x22   : > { %s2318_s14 = scalar_select %p2001_p6, 1, 0 }
  0x23   : > { %p2008_p10 = por %p371_p7, %p370_p5  ;;  %p1347_p11 = scmp.ge.s32.totalorder %s1841_s23, 1 }
  0x24   : > { %p2013_p12 = por %p377_p9, %p376_p8  ;;  %p384_p13 = scmp.lt.s32.totalorder %s1841_s23, 7 }
  0x25   : > { %s2319_s16 = scalar_select %p2008_p10, 1, 0 }
  0x26   : > { %s2321_s26 = scalar_select %p2013_p12, 1, 0 }
  0x27   : > { %2320 = sst [smem:[#allocation19_spill]] %s2319_s16  ;;  %p2018_p0 = pnand %p1347_p11, %p384_p13 }
  0x28   : > { %2322 = sst [smem:[#allocation20_spill]] %s2321_s26  ;;  %s1843_s20 = smov [#allocation9]  }
  0x29   : > { %s2323_s27 = scalar_select %p2018_p0, 1, 0 }
  0x2a   : > { %s409_s12 = sshll.u32 %s1843_s20, 4  ;;  %p1508_p1 = pneg %p2018_p0  ;;  %s410_s12 = int_to_ptr.vmem [resolvable:$true] %s409_s12 }
  0x2b   : > { %p1524_p2 = scmp.lt.s32.totalorder %s1841_s23, 6  ;;  %s1642_s26 = scalar_lea.vmem %s410_s12, 128 }
  0x2c   : > { %p1509_p5 = pnand %p1508_p1, %p68_p3  ;;  %p1643_p9 = scmp.ne.s32.totalorder %s410_s12, %s1642_s26 }
  0x2d   : > { %p2029_p7 = pnand %p1524_p2, %p1993_p4  ;;  %p1650_p12 = scmp.lt.s32.totalorder %s410_s12, %s410_s12 }
  0x2e   : > { %p1633_p8 = pneg %p1509_p5  ;;  %p1651_p10 = scmp.lt.s32.totalorder %s1642_s26, %s1642_s26 }
  0x30   : > { %p1645_p11 = pnand %p1643_p9, %p1633_p8  ;;  %p1652_p6 = por %p1651_p10, %p1650_p12 }
  0x32   : > { %p1646_p13 = pneg %p1645_p11 }
  0x34   : > { %p1653_p0 = pnand %p1652_p6, %p1646_p13 }
  0x36   : > { %1656 = shalt.err (!%p1653_p0)
}
  0x37   : > { %s2325_s6 = sld [smem:[#allocation29_spill]]  ;;  %s42_s28 = sadd.s32 1, %s1833_s21 }
  0x38   : > { %s45_s16 = sadd.s32 1, %s1837_s22  ;;  %p43_p4 = scmp.ge.s32.totalorder %s42_s28, 3 }
  0x39   : > { %s441_s10 = sand.u32 1, %s1821_s18   ;;  %s2328_s0 = sld [smem:[#allocation24_spill]] }
  0x3a   : > { %s2039_s26 = sshll.u32 %s441_s10, 5  ;;  %s2367_s28 = smov (%p43_p4, %s42_s28), 0 }
  0x3b   : > { %2326 = sst [smem:[#allocation21_spill]] %s2367_s28  ;;  %s2369_s16 = smov (!%p43_p4, %s45_s16), %s1837_s22 }
  0x3c   : > { %s49_s29 = ssub.s32 %s1833_s21, %s2367_s28  ;;  %p47_p6 = scmp.ge.s32.totalorder %s2369_s16, 2 }
  0x3d   : > { %1511 = dma.hbm_to_vmem [thread:$0]  (!%p1509_p5), %s2325_s6, 128, %s410_s12, [#allocation8]  }
  0x3e   : > { %s1380_s12 = sshll.u32 %s1833_s21, 3  ;;  %s445_s6 = scalar_lea.vmem [#allocation4], %s2039_s26 }
  0x3f   : > { %s2048_s20 = sadd.s32 %s1837_s22, %s1380_s12  ;;  %s454_s13 = sshll.u32 %s445_s6, 4  ;;  %s2054_s13 = int_to_ptr.vmem [resolvable:$true] %s454_s13 }
  0x40   : > { %s2371_s16 = smov (%p47_p6, %s2369_s16), 0  ;;  %s1353_s7 = sshll.u32 %s2048_s20, 7 }
  0x41   : > { %2327 = sst [smem:[#allocation22_spill]] %s2371_s16  ;;  %s50_s11 = ssub.s32 %s1837_s22, %s2371_s16 }
  0x42   : > { %s453_s12 = scalar_lea.hbm %s2328_s0, %s1353_s7  ;;  %s51_s21 = sor.u32 %s50_s11, %s49_s29 }
  0x43   : > { %p358_p10 = scmp.eq.s32.totalorder %s50_s11, 0  ;;  %p52_p12 = scmp.eq.s32.totalorder %s51_s21, 0 }
  0x44   : > { %s2329_s4 = sadd.s32 1, %s1809_s15  ;;  %s2330_s5 = sadd.s32 1, %s1821_s18 }
  0x45   : > { %s2066_s6 = scalar_select %p358_p10, %s1809_s15, %s2329_s4  }
  0x46   : > { %s2071_s3 = scalar_select %p52_p12, %s1821_s18, %s2330_s5  }
  0x47   : > { %s442_s8 = scalar_lea.sflag [#allocation5], %s441_s10  ;;  %p1659_p0 = pneg %p2029_p7 }
  0x48   : > { %2331 = sst [smem:[#allocation23_spill]] %s2071_s3  ;;  %s1670_s2 = scalar_lea.vmem %s2054_s13, 512 }
  0x49   : > { %p1671_p1 = scmp.ne.s32.totalorder %s2054_s13, %s1670_s2  ;;  %s1844_s9 = smov [#allocation4]  }
  0x4a   : > { %s1675_s28 = sshll.u32 %s1844_s9, 4  ;;  %s1676_s28 = int_to_ptr.vmem [resolvable:$false] %s1675_s28 }
  0x4b   : > { %p1673_p2 = pnand %p1671_p1, %p1659_p0  ;;  %s1677_s11 = scalar_lea.vmem %s1676_s28, 1024 }
  0x4c   : > { %p1678_p8 = scmp.lt.s32.totalorder %s2054_s13, %s1676_s28  ;;  %p1679_p9 = scmp.lt.s32.totalorder %s1677_s11, %s1670_s2 }
  0x4d   : > { %p1674_p5 = pneg %p1673_p2 }
  0x4e   : > { %p1680_p11 = por %p1679_p9, %p1678_p8 }
  0x50   : > { %p1681_p13 = pnand %p1680_p11, %p1674_p5 }
  0x52   : > { %1684 = shalt.err (!%p1681_p13)
}
  0x53   : > { %s1845_s4 = smov 256   ;;  %s1846_s5 = smov 128  }
  0x54   : > { %s1847_s10 = smov 8   ;;  %s476_s9 = scalar_lea.hbm %s2267_s1, %s1353_s7 }
  0x55   : > { %1515 = dma.hbm_to_vmem [thread:$0]  (!%p2029_p7), %s453_s12, 512, %s2054_s13, %s442_s8, %s1845_s4, %s1846_s5, %s1847_s10  }
  0x56   : > { %s468_s2 = scalar_lea.vmem [#allocation7], %s2039_s26  ;;  %s464_s11 = sand.u32 1, %s1841_s23  }
  0x57   : > { %s477_s28 = sshll.u32 %s468_s2, 4  ;;  %s465_s0 = scalar_lea.sflag [#allocation8], %s464_s11  ;;  %s478_s28 = int_to_ptr.vmem [resolvable:$true] %s477_s28 }
  0x58   : > { %s1698_s16 = scalar_lea.vmem %s478_s28, 512  ;;  %s1848_s22 = smov [#allocation7]  }
  0x59   : > { %p1699_p4 = scmp.ne.s32.totalorder %s478_s28, %s1698_s16  ;;  %s1703_s3 = sshll.u32 %s1848_s22, 4  ;;  %s1704_s3 = int_to_ptr.vmem [resolvable:$false] %s1703_s3 }
  0x5a   : > { %s1705_s8 = scalar_lea.vmem %s1704_s3, 1024  ;;  %p1706_p12 = scmp.lt.s32.totalorder %s478_s28, %s1704_s3 }
  0x5b   : > { %p1701_p6 = pnand %p1699_p4, %p1659_p0  ;;  %p1707_p1 = scmp.lt.s32.totalorder %s1705_s8, %s1698_s16 }
  0x5d   : > { %p1702_p10 = pneg %p1701_p6  ;;  %p1708_p2 = por %p1707_p1, %p1706_p12 }
  0x5f   : > { %p1709_p5 = pnand %p1708_p2, %p1702_p10 }
  0x61   : > { %1712 = shalt.err (!%p1709_p5)
}
  0x62   : > { %1518 = dma.hbm_to_vmem [thread:$0]  (!%p2029_p7), %s476_s9, 512, %s478_s28, %s465_s0, %s1845_s4, %s1846_s5, %s1847_s10  }
  0x63   : > { %p2332_p8 = scmp.ne.s32.totalorder %s2323_s27, 0 }
  0x64   : > { %s491_s7 = sand.u32 (!%p2332_p8), 1, %s1817_s17   ;;  %p2333_p0 = scmp.ne.s32.totalorder (!%p2332_p8), %s2318_s14, 0 }
  0x65   : > { %489 = sbr.rel (%p2332_p8) target bundleno = 1169 (0x491), region = 76  ;;  %s1359_s13 = sshll.u32 (!%p2332_p8), %s491_s7, 5 }
  0x66   : > { %s492_s26 = scalar_lea.sflag (!%p2332_p8), [#allocation5], %s491_s7  ;;  %s2099_s20 = scalar_lea.vmem (!%p2332_p8), [#allocation4], %s1359_s13 }
  0x6a   : > { %1784 = dma.done.wait (%p2333_p0), %s492_s26, 512  }
  0x6b   : > { %1786 = vsyncadd (%p2333_p0), %s492_s26, 4294966784  ;;  %s500_s3 = sand.u32 1, %s1983_s24   ;;  %s2106_s0 = scalar_lea.vmem [#allocation7], %s1359_s13 }
  0x6c   : > { %s501_s22 = scalar_lea.sflag [#allocation8], %s500_s3 }
  0x6d   : > { %1788 = dma.done.wait (%p2333_p0), %s501_s22, 512  }
  0x6e   : > { %1790 = vsyncadd (%p2333_p0), %s501_s22, 4294966784 }
  0x6f   : > { %1792 = dma.done.wait (%p68_p3), [#allocation8], 128  }
  0x70   : > { %1794 = vsyncadd (%p68_p3), [#allocation8], 4294967168  ;;  %s555_s27 = sand.u32 1, %s1805_s30   ;;  %p1362_p7 = scmp.ne.s32.totalorder %s1825_s19, 0 }
  0x71   : > { %s2119_s16 = scalar_lea.vmem [#allocation10], %s555_s27 }
  0x72   : > { %563 = sbr.rel (%p1362_p7) target bundleno = 124 (0x7c), region = 92 }
  0x77   : > { %v1849_v0 = vmov 0.0  }
  0x78   : > { %564 = vst [vmem:[#allocation2 + $0x10] sm:$0xff] %v1849_v0  ;;  %565 = vst [vmem:[#allocation2] sm:$0xff] %v1849_v0 }
  0x79   : > { %566 = vst [vmem:[#allocation2 + $0x18] sm:$0xff] %v1849_v0  ;;  %567 = vst [vmem:[#allocation2 + $0x8] sm:$0xff] %v1849_v0 }
  0x7a   : > { %568 = vst [vmem:[#allocation3] sm:$0xff] %v1849_v0  ;;  %569 = vst [vmem:[#allocation3 + $0x18] sm:$0xff] %v1849_v0 }
  0x7b   : > { %570 = vst [vmem:[#allocation3 + $0x8] sm:$0xff] %v1849_v0  ;;  %571 = vst [vmem:[#allocation3 + $0x10] sm:$0xff] %v1849_v0 }
  0x7c PF: > { %v575_v1 = vld [vmem:[%s2099_s20 + $0x18] sm:$0xff]  ;;  %s1382_s14 = sshll.u32 %s1825_s19, 4  ;;  %s2334_s12 = sld [smem:[#allocation25_spill]]  ;;  %v574_v7 = vld [vmem:[%s2099_s20 + $0x10] sm:$0xff]  ;;  %v573_v15 = vld [vmem:[%s2099_s20 + $0x8] sm:$0xff] }
  0x7d   : > { %v587_v2 = vld [vmem:[%s2106_s0 + $0x18] sm:$0xff]  ;;  %v582_v3 = vunpack.c.l.s8.bf16 %v575_v1  ;;  %v583_v4 = vunpack.c.h.s8.bf16 %v575_v1  ;;  %s2335_s21 = sld [smem:[#allocation31_spill]]  ;;  %v586_v8 = vld [vmem:[%s2106_s0 + $0x10] sm:$0xff]  ;;  %v581_v11 = vunpack.c.h.s8.bf16 %v574_v7  ;;  %v580_v13 = vunpack.c.l.s8.bf16 %v574_v7  ;;  %v585_v16 = vld [vmem:[%s2106_s0 + $0x8] sm:$0xff]  ;;  %p1370_p3 = scmp.ne.s32.totalorder %s1825_s19, 2 }
  0x7e   : > { %v594_v5 = vunpack.c.l.s8.bf16 %v587_v2  ;;  %v595_v6 = vunpack.c.h.s8.bf16 %v587_v2  ;;  %v593_v12 = vunpack.c.h.s8.bf16 %v586_v8  ;;  %v592_v14 = vunpack.c.l.s8.bf16 %v586_v8  ;;  %v572_v21 = vld [vmem:[%s2099_s20] sm:$0xff]  ;;  %s2336_s28 = sld [smem:[#allocation26_spill]] (!%p1370_p3) }
  0x7f   : > { %1422 = vmatprep.subr.bf16.mxu0 %v583_v4  ;;  %v579_v17 = vunpack.c.h.s8.bf16 %v573_v15  ;;  %v591_v18 = vunpack.c.h.s8.bf16 %v585_v16  ;;  %v578_v19 = vunpack.c.l.s8.bf16 %v573_v15  ;;  %v590_v20 = vunpack.c.l.s8.bf16 %v585_v16  ;;  %v584_v22 = vld [vmem:[%s2106_s0] sm:$0xff]  ;;  %v609_v33 = vld [vmem:[#allocation2 + $0x10] sm:$0xff]  ;;  %s2337_s22 = sld [smem:[#allocation28_spill]] (!%p1370_p3) }
  0x80   : > { %1442 = vmatprep.subr.bf16.mxu1 %v595_v6  ;;  %1423 = vmatpush3.bf16.msra.mxu0 %v583_v4  ;;  %v577_v23 = vunpack.c.h.s8.bf16 %v572_v21  ;;  %v589_v24 = vunpack.c.h.s8.bf16 %v584_v22  ;;  %v576_v25 = vunpack.c.l.s8.bf16 %v572_v21  ;;  %v588_v26 = vunpack.c.l.s8.bf16 %v584_v22  ;;  %v611_v29 = vld [vmem:[#allocation2 + $0x18] sm:$0xff]  ;;  %v612_v39 = vld [vmem:[#allocation2 + $0x8] sm:$0xff]  ;;  %v610_v45 = vld [vmem:[#allocation2] sm:$0xff]  ;;  %s2342_s20 = sld [smem:[#allocation34_spill]] (!%p1370_p3) }
  0x81   : > { %1443 = vmatpush3.bf16.msra.mxu1 %v595_v6  ;;  %1424 = vmatprep.subr.bf16.mxu0 %v582_v3  ;;  %v682_v34 = vld [vmem:[#allocation3] sm:$0xff]  ;;  %v683_v46 = vld [vmem:[#allocation3 + $0x18] sm:$0xff]  ;;  %s2346_s7 = sld [smem:[#allocation33_spill]] (!%p1370_p3) }
  0x82   : > { %s2128_s4 = scalar_lea.vmem %s2334_s12, %s1382_s14  ;;  %1444 = vmatprep.subr.bf16.mxu1 %v594_v5  ;;  %v684_v30 = vld [vmem:[#allocation3 + $0x8] sm:$0xff]  ;;  %v685_v40 = vld [vmem:[#allocation3 + $0x10] sm:$0xff]  ;;  %s2344_s12 = sld [smem:[#allocation30_spill]] (!%p1370_p3) }
  0x83   : > { %s2133_s29 = scalar_lea.vmem %s2335_s21, %s1382_s14  ;;  %v1623_v9 = vld [vmem:[%s2128_s4] sm:$0xff]   ;;  %v1625_v27 = vld [vmem:[%s2128_s4 + $0x8] sm:$0xff]   ;;  %s2339_s4 = sld [smem:[#allocation27_spill]] (!%p1370_p3) }
  0x84   : > { %v1624_v10 = vld [vmem:[%s2133_s29] sm:$0xff]   ;;  %1438 = vmatprep.mubr.bf16.mxu0 %v1623_v9  ;;  %1425 = vmatpush3.bf16.msra.mxu0 %v582_v3  ;;  %v1626_v28 = vld [vmem:[%s2133_s29 + $0x8] sm:$0xff]   ;;  %s2340_s21 = sld [smem:[#allocation32_spill]] (!%p1370_p3) }
  0x85   : > { %1458 = vmatprep.mubr.bf16.mxu1 %v1624_v10  ;;  %1445 = vmatpush3.bf16.msra.mxu1 %v594_v5  ;;  %s2338_s0 = smov (!%p1370_p3), %s2337_s22 }
  0x86   : > { %1426 = vmatprep.subr.bf16.mxu0 %v581_v11  ;;  %1446 = vmatprep.subr.bf16.mxu1 %v593_v12  ;;  %s2343_s3 = smov (!%p1370_p3), %s2342_s20 }
  0x88   : > { %1427 = vmatpush3.bf16.msra.mxu0 %v581_v11 }
  0x89   : > { %1447 = vmatpush3.bf16.msra.mxu1 %v593_v12  ;;  %1428 = vmatprep.subr.bf16.mxu0 %v580_v13 }
  0x8a   : > { %1448 = vmatprep.subr.bf16.mxu1 %v592_v14  ;;  %s2341_s9 = smov (!%p1370_p3), %s2340_s21 }
  0x8c   : > { %1429 = vmatpush3.bf16.msra.mxu0 %v580_v13 }
  0x8d   : > { %1449 = vmatpush3.bf16.msra.mxu1 %v592_v14  ;;  %1430 = vmatprep.subr.bf16.mxu0 %v579_v17 }
  0x8e   : > { %1450 = vmatprep.subr.bf16.mxu1 %v591_v18 }
  0x90   : > { %1431 = vmatpush3.bf16.msra.mxu0 %v579_v17 }
  0x91   : > { %1451 = vmatpush3.bf16.msra.mxu1 %v591_v18  ;;  %1432 = vmatprep.subr.bf16.mxu0 %v578_v19 }
  0x92   : > { %1452 = vmatprep.subr.bf16.mxu1 %v590_v20 }
  0x94   : > { %1433 = vmatpush3.bf16.msra.mxu0 %v578_v19 }
  0x95   : > { %1453 = vmatpush3.bf16.msra.mxu1 %v590_v20  ;;  %1434 = vmatprep.subr.bf16.mxu0 %v577_v23 }
  0x96   : > { %1454 = vmatprep.subr.bf16.mxu1 %v589_v24 }
  0x98   : > { %1435 = vmatpush3.bf16.msra.mxu0 %v577_v23 }
  0x99   : > { %1455 = vmatpush3.bf16.msra.mxu1 %v589_v24  ;;  %1436 = vmatprep.subr.bf16.mxu0 %v576_v25 }
  0x9a   : > { %1456 = vmatprep.subr.bf16.mxu1 %v588_v26 }
  0x9c   : > { %1437 = vmatpush3.bf16.msra.mxu0 %v576_v25 }
  0x9d   : > { %1457 = vmatpush3.bf16.msra.mxu1 %v588_v26 }
  0x9f   : > { %1439 = vmatmul.mubr.bf16.vlgmr.msra.gmra.mxu0 %v1625_v27 }
  0xa0   : > { %1459 = vmatmul.mubr.bf16.vlgmr.msra.gmra.mxu1 %v1626_v28 }
 0x15f   : > { %v1440_v31 = vpop.f32.mrf.mxu0 }
 0x160   : > { %v1460_v32 = vpop.f32.mrf.mxu1  ;;  %v676_v35 = vadd.f32 %v1440_v31, %v611_v29 }
 0x161   : > { %v749_v36 = vadd.f32 %v1460_v32, %v684_v30  ;;  %v659_v37 = vpop.f32.mrf.mxu0 }
 0x162   : > { %v732_v38 = vpop.f32.mrf.mxu1  ;;  %680 = vst [vmem:[#allocation2 + $0x18] sm:$0xff] %v676_v35  ;;  %v674_v41 = vadd.f32 %v659_v37, %v609_v33 }
 0x163   : > { %753 = vst [vmem:[#allocation3 + $0x8] sm:$0xff] %v749_v36  ;;  %v747_v42 = vadd.f32 %v732_v38, %v682_v34  ;;  %v1441_v43 = vpop.f32.mrf.mxu0 }
 0x164   : > { %v1461_v44 = vpop.f32.mrf.mxu1  ;;  %678 = vst [vmem:[#allocation2 + $0x10] sm:$0xff] %v674_v41  ;;  %v677_v47 = vadd.f32 %v1441_v43, %v612_v39 }
 0x165   : > { %751 = vst [vmem:[#allocation3] sm:$0xff] %v747_v42  ;;  %v750_v48 = vadd.f32 %v1461_v44, %v685_v40  ;;  %v662_v49 = vpop.f32.mrf.mxu0  ;;  %758 = sbr.rel (%p1370_p3) target bundleno = 1142 (0x476), region = 96 }
 0x166   : > { %v735_v50 = vpop.f32.mrf.mxu1  ;;  %681 = vst [vmem:[#allocation2 + $0x8] sm:$0xff] %v677_v47  ;;  %v675_v51 = vadd.f32 %v662_v49, %v610_v45 }
 0x167   : > { %754 = vst [vmem:[#allocation3 + $0x10] sm:$0xff] %v750_v48  ;;  %v748_v52 = vadd.f32 %v735_v50, %v683_v46 }
 0x168   : > { %679 = vst [vmem:[#allocation2] sm:$0xff] %v675_v51 }
 0x169   : > { %752 = vst [vmem:[#allocation3 + $0x18] sm:$0xff] %v748_v52 }
 0x16a   : > { %v766_v53 = vld [vmem:[%s2336_s28 + $0x18] sm:$0xff]  ;;  %v764_v54 = vld [vmem:[%s2336_s28 + $0x8] sm:$0xff]  ;;  %v1850_v55 = vmov 0   ;;  %v765_v56 = vld [vmem:[%s2336_s28 + $0x10] sm:$0xff]  ;;  %vm809_vm0 = vcmask 261120   ;;  %v1851_v22 = vmov 0.0  }
 0x16b   : > { %1628 = vset.pattern.permute.xlu1 %v1850_v55  ;;  %1627 = vset.pattern.permute.xlu0 %v1850_v55  ;;  %v763_v57 = vld [vmem:[%s2336_s28] sm:$0xff]  ;;  %v798_v58 = vld [vmem:[%s2337_s22 + $0x8] sm:$0xff]  ;;  %v982_v61 = vld [vmem:[%s2340_s21 + $0x18] sm:$0xff]  ;;  %s2345_s21 = sld [smem:[#allocation36_spill]]  ;;  %vm1852_vm1 = vmmov 0   ;;  %vm900_vm2 = vcmask 130048  }
 0x16c   : > { %784 = vperm.xlu0 %1627, %v766_v53   ;;  %774 = vperm.xlu1 %1628, %v764_v54   ;;  %v797_v59 = vld [vmem:[%s2338_s0] sm:$0xff]  ;;  %v981_v62 = vld [vmem:[%s2341_s9 + $0x10] sm:$0xff]  ;;  %v980_v63 = vld [vmem:[%s2341_s9 + $0x8] sm:$0xff]  ;;  %s2347_s22 = sld [smem:[#allocation35_spill]] }
 0x16d   : > { %v795_v60 = vld [vmem:[%s2339_s4] sm:$0xff]  ;;  %v1014_v1 = vld [vmem:[%s2342_s20 + $0x8] sm:$0xff]  ;;  %v761_v10 = vld [vmem:[#allocation2 + $0x18] sm:$0xff]  ;;  %1473 = vmatprep.subr.mxu1 %v1851_v22  ;;  %1477 = vmatprep.mubr.msk.f32.mxu1 %vm1852_vm1, %v1851_v22 }
 0x16e   : > { %1470 = vmatprep.mubr.msk.f32.mxu0 %vm809_vm0, %v795_v60  ;;  %v979_v0 = vld [vmem:[%s2341_s9] sm:$0xff]  ;;  %v762_v5 = vld [vmem:[#allocation2 + $0x8] sm:$0xff]  ;;  %v759_v14 = vld [vmem:[#allocation2 + $0x10] sm:$0xff] }
 0x16f   : > { %v1013_v2 = vld [vmem:[%s2343_s3] sm:$0xff]  ;;  %v796_v21 = vld [vmem:[%s2339_s4 + $0x8] sm:$0xff]  ;;  %v978_v26 = vld [vmem:[#allocation3 + $0x10] sm:$0xff] }
 0x170   : > { %779 = vperm.xlu0 %1627, %v765_v56   ;;  %769 = vperm.xlu1 %1628, %v763_v57   ;;  %v894_v3 = vld [vmem:[%s2344_s12] sm:$0xff]  ;;  %v977_v29 = vld [vmem:[#allocation3 + $0x8] sm:$0xff]  ;;  %v976_v33 = vld [vmem:[#allocation3 + $0x18] sm:$0xff] }
 0x171   : > { %v1109_v4 = vld [vmem:[%s2345_s21] sm:$0xff]  ;;  %v1012_v49 = vld [vmem:[%s2346_s7 + $0x8] sm:$0xff] }
 0x172   : > { %v760_v9 = vld [vmem:[#allocation2] sm:$0xff] }
 0x173   : > { %v975_v38 = vld [vmem:[#allocation3] sm:$0xff] }
 0x174   : > { %806 = vperm.xlu0 %1627, %v798_v58   ;;  %801 = vperm.xlu1 %1628, %v797_v59   ;;  %v893_v41 = vld [vmem:[#allocation9] sm:$0xff] }
 0x175   : > { %v1011_v44 = vld [vmem:[%s2346_s7] sm:$0xff] }
 0x176   : > { %v1108_v60 = vld [vmem:[%s2347_s22] sm:$0xff] }
 0x178   : > { %1000 = vperm.xlu0 %1627, %v982_v61   ;;  %995 = vperm.xlu1 %1628, %v981_v62  }
 0x17c   : > { %990 = vperm.xlu0 %1627, %v980_v63   ;;  %985 = vperm.xlu1 %1628, %v979_v0  }
 0x180   : > { %1022 = vperm.xlu0 %1627, %v1014_v1   ;;  %1017 = vperm.xlu1 %1628, %v1013_v2  }
 0x184   : > { %897 = vperm.xlu0 %1627, %v894_v3   ;;  %1112 = vperm.xlu1 %1628, %v1109_v4  }
 0x1e7   : > { %v785_v6 = vpop.permute.xlu0 %784  ;;  %v775_v7 = vpop.permute.xlu1 %774 }
 0x1e8   : > { %v790_v8 = vadd.f32 %v785_v6, %v762_v5  ;;  %v788_v15 = vadd.f32 %v775_v7, %v760_v9 }
 0x1ea   : > { %v794_v11 = vmax.f32 %v790_v8, 0.0  ;;  %v792_v19 = vmax.f32 %v788_v15, 0.0 }
 0x1eb   : > { %v780_v12 = vpop.permute.xlu0 %779  ;;  %v770_v13 = vpop.permute.xlu1 %769 }
 0x1ec   : > { %v789_v16 = vadd.f32 %v780_v12, %v761_v10  ;;  %1462 = vmatprep.subr.mxu0 %v794_v11  ;;  %v787_v18 = vadd.f32 %v770_v13, %v759_v14 }
 0x1ed   : > { %1463 = vmatpush3.msra.mxu0 %v794_v11 }
 0x1ee   : > { %v793_v17 = vmax.f32 %v789_v16, 0.0  ;;  %v791_v20 = vmax.f32 %v787_v18, 0.0 }
 0x1ef   : > { %v807_v23 = vpop.permute.xlu0 %806  ;;  %v802_v24 = vpop.permute.xlu1 %801 }
 0x1f0   : > { %1464 = vmatprep.subr.mxu0 %v793_v17 }
 0x1f1   : > { %1465 = vmatpush3.msra.mxu0 %v793_v17 }
 0x1f2   : > { %1466 = vmatprep.subr.mxu0 %v792_v19 }
 0x1f3   : > { %1467 = vmatpush3.msra.mxu0 %v792_v19  ;;  %v1001_v25 = vpop.permute.xlu0 %1000  ;;  %v996_v27 = vpop.permute.xlu1 %995 }
 0x1f4   : > { %1468 = vmatprep.subr.mxu0 %v791_v20  ;;  %v1006_v31 = vadd.f32 %v1001_v25, %v978_v26  ;;  %v1005_v37 = vadd.f32 %v996_v27, %v977_v29 }
 0x1f5   : > { %1469 = vmatpush3.msra.mxu0 %v791_v20 }
 0x1f6   : > { %1471 = vmatmul.mubr.msk.f32.vlgmr.msra.gmra.mxu0 %vm809_vm0, %v796_v21  ;;  %1491 = vmatprep.subr.mxu0 %v1851_v22  ;;  %v1010_v42 = vmax.f32 %v1006_v31, 0.0  ;;  %v1009_v45 = vmax.f32 %v1005_v37, 0.0 }
 0x1f7   : > { %1495 = vmatprep.mubr.msk.f32.mxu0 %vm1852_vm1, %v1851_v22  ;;  %v991_v34 = vpop.permute.xlu0 %990  ;;  %v986_v39 = vpop.permute.xlu1 %985 }
 0x1f8   : > { %v1004_v43 = vadd.f32 %v991_v34, %v976_v33  ;;  %v1003_v46 = vadd.f32 %v986_v39, %v975_v38 }
 0x1fa   : > { %v1008_v47 = vmax.f32 %v1004_v43, 0.0  ;;  %v1007_v48 = vmax.f32 %v1003_v46, 0.0 }
 0x1fb   : > { %v1023_v52 = vpop.permute.xlu0 %1022  ;;  %v1018_v55 = vpop.permute.xlu1 %1017 }
 0x1ff   : > { %v898_v61 = vpop.permute.xlu0 %897  ;;  %v1113_v2 = vpop.permute.xlu1 %1112 }
 0x2b6   : > { %v1472_v28 = vpop.f32.mrf.mxu0 }
 0x2b7   : > { %v888_v30 = vadd.f32 %v1472_v28, %v807_v23 }
 0x2b8   : > { %v882_v32 = vpop.f32.mrf.mxu0 }
 0x2b9   : > { %v892_v35 = vmax.f32 %v888_v30, 0.0  ;;  %v883_v36 = vadd.f32 %v882_v32, %v802_v24 }
 0x2bb   : > { %v891_v40 = vmax.f32 %v883_v36, 0.0  ;;  %1474 = vmatpush3.msra.mxu1 %v892_v35 }
 0x2bc   : > { %1475 = vmatprep.subr.mxu1 %v1851_v22 }
 0x2bd   : > { %1476 = vmatpush3.msra.mxu1 %v891_v40 }
 0x2be   : > { %1478 = vmatmul.mubr.msk.f32.vlgmr.msra.gmra.mxu1 %vm900_vm2, %v893_v41  ;;  %1480 = vmatprep.subr.mxu1 %v1010_v42 }
 0x2bf   : > { %1481 = vmatpush3.msra.mxu1 %v1010_v42  ;;  %1488 = vmatprep.mubr.msk.f32.mxu1 %vm809_vm0, %v1011_v44 }
 0x2c0   : > { %1482 = vmatprep.subr.mxu1 %v1009_v45 }
 0x2c1   : > { %1483 = vmatpush3.msra.mxu1 %v1009_v45 }
 0x2c2   : > { %1484 = vmatprep.subr.mxu1 %v1008_v47 }
 0x2c3   : > { %1485 = vmatpush3.msra.mxu1 %v1008_v47 }
 0x2c4   : > { %1486 = vmatprep.subr.mxu1 %v1007_v48 }
 0x2c5   : > { %1487 = vmatpush3.msra.mxu1 %v1007_v48 }
 0x2c6   : > { %1489 = vmatmul.mubr.msk.f32.vlgmr.msra.gmra.mxu1 %vm809_vm0, %v1012_v49 }
 0x37e   : > { %v970_v50 = vpop.f32.mrf.mxu1 }
 0x37f   : > { %v971_v62 = vadd.f32 %v970_v50, %v898_v61 }
 0x380   : > { %v1479_v51 = vpop.f32.mrf.mxu1 }
 0x381   : > { %v974_v63 = vmax.f32 %v971_v62, 0.0 }
 0x383   : > { %v1196_v0 = vmul.f32 %v974_v63, %v974_v63 }
 0x385   : > { %v1197_v1 = vrot.slane %v1196_v0, 4 }
 0x386   : > { %v1490_v53 = vpop.f32.mrf.mxu1 }
 0x387   : > { %v1103_v54 = vadd.f32 %v1490_v53, %v1023_v52  ;;  %v1198_v4 = vadd.f32 %v1197_v1, %v1196_v0 }
 0x388   : > { %v1097_v56 = vpop.f32.mrf.mxu1 }
 0x389   : > { %v1107_v57 = vmax.f32 %v1103_v54, 0.0  ;;  %v1098_v58 = vadd.f32 %v1097_v56, %v1018_v55  ;;  %v1199_v8 = vrot.slane %v1198_v4, 2 }
 0x38b   : > { %v1106_v59 = vmax.f32 %v1098_v58, 0.0  ;;  %1492 = vmatpush3.msra.mxu0 %v1107_v57  ;;  %v1200_v11 = vadd.f32 %v1199_v8, %v1198_v4 }
 0x38c   : > { %1493 = vmatprep.subr.mxu0 %v1851_v22 }
 0x38d   : > { %1494 = vmatpush3.msra.mxu0 %v1106_v59  ;;  %v1201_v15 = vrot.slane %v1200_v11, 1 }
 0x38e   : > { %1496 = vmatmul.mubr.msk.f32.vlgmr.msra.gmra.mxu0 %vm900_vm2, %v1108_v60 }
 0x38f   : > { %v1202_v19 = vadd.f32 %v1201_v15, %v1200_v11 }
 0x44e   : > { %v1184_v3 = vpop.f32.mrf.mxu0 }
 0x44f   : > { %v1185_v5 = vadd.f32 %v1184_v3, %v1113_v2 }
 0x450   : > { %v1497_v6 = vpop.f32.mrf.mxu0 }
 0x451   : > { %v1188_v7 = vmax.f32 %v1185_v5, 0.0 }
 0x453   : > { %v1203_v9 = vmul.f32 %v1188_v7, %v1188_v7  ;;  %v1189_v13 = vmul.f32 %v1188_v7, %v974_v63 }
 0x455   : > { %v1204_v10 = vrot.slane %v1203_v9, 4  ;;  %v1190_v17 = vrot.slane %v1189_v13, 4 }
 0x457   : > { %v1205_v12 = vadd.f32 %v1204_v10, %v1203_v9  ;;  %v1191_v21 = vadd.f32 %v1190_v17, %v1189_v13 }
 0x459   : > { %v1206_v14 = vrot.slane %v1205_v12, 2  ;;  %v1192_v24 = vrot.slane %v1191_v21, 2 }
 0x45b   : > { %v1207_v16 = vadd.f32 %v1206_v14, %v1205_v12  ;;  %v1193_v25 = vadd.f32 %v1192_v24, %v1191_v21 }
 0x45d   : > { %v1208_v18 = vrot.slane %v1207_v16, 1  ;;  %v1194_v26 = vrot.slane %v1193_v25, 1 }
 0x45f   : > { %v1209_v20 = vadd.f32 %v1208_v18, %v1207_v16  ;;  %v1195_v27 = vadd.f32 %v1194_v26, %v1193_v25 }
 0x461   : > { %v1210_v22 = vmul.f32 %v1209_v20, %v1202_v19 }
 0x463   : > { %v1211_v23 = vmax.f32 %v1210_v22, 1e-24 }
 0x465   : > { %1629 = vrsqrt.f32 %v1211_v23 }
 0x472   : > { %v1630_v28 = vpop.eup %1629 }
 0x473   : > { %v1213_v29 = vmul.f32 %v1630_v28, %v1195_v27 }
 0x475   : > { %1214 = vst [vmem:[%s2119_s16] sm:$0x1] %v1213_v29 }
 0x476 PF: > { %s2348_s14 = sld [smem:[#allocation16_spill]]  ;;  %s1228_s29 = sshll.u32 %s2119_s16, 4  ;;  %s1229_s29 = int_to_ptr.vmem [resolvable:$true] %s1228_s29 }
 0x477   : > { %s2349_s24 = sld [smem:[#allocation19_spill]]  ;;  %s1216_s2 = scalar_lea.sflag [#allocation6], %s555_s27 }
 0x478   : > { %s2350_s10 = sld [smem:[#allocation37_spill]]  ;;  %s1713_s11 = scalar_lea.vmem %s1229_s29, 16 }
 0x479   : > { %p1714_p9 = scmp.ne.s32.totalorder %s1229_s29, %s1713_s11  ;;  %s1853_s8 = smov [#allocation10]  }
 0x47a   : > { %s1717_s13 = sshll.u32 %s1853_s8, 4  ;;  %s1718_s13 = int_to_ptr.vmem [resolvable:$false] %s1717_s13 }
 0x47b   : > { %s1719_s26 = scalar_lea.vmem %s1718_s13, 32  ;;  %p1720_p6 = scmp.lt.s32.totalorder %s1229_s29, %s1718_s13 }
 0x47c   : > { %s1377_s25 = sshll.u32 %s2348_s14, 4  ;;  %p1721_p10 = scmp.lt.s32.totalorder %s1719_s26, %s1713_s11 }
 0x47d   : > { %p2351_p11 = scmp.ne.s32.totalorder %s2349_s24, 0 }
 0x47e   : > { %s1226_s21 = scalar_lea.hbm %s2350_s10, %s1377_s25  ;;  %p1722_p12 = por %p1721_p10, %p1720_p6 }
 0x47f   : > { %p1715_p13 = pnand %p1714_p9, %p2351_p11 }
 0x481   : > { %p1716_p4 = pneg %p1715_p13 }
 0x483   : > { %p1723_p1 = pnand %p1722_p12, %p1716_p4 }
 0x485   : > { %1726 = shalt.err (!%p1723_p1)
}
 0x486   : > { %s1727_s19 = scalar_lea.hbm %s1226_s21, 16  ;;  %s1731_s20 = scalar_lea.hbm %s2350_s10, 32 }
 0x487   : > { %p1728_p2 = scmp.ne.s32.totalorder %s1226_s21, %s1727_s19  ;;  %p1732_p0 = scmp.lt.s32.totalorder %s1226_s21, %s2350_s10 }
 0x488   : > { %p1733_p7 = scmp.lt.s32.totalorder %s1731_s20, %s1727_s19 }
 0x489   : > { %p1729_p5 = pnand %p1728_p2, %p2351_p11 }
 0x48a   : > { %p1734_p3 = por %p1733_p7, %p1732_p0 }
 0x48b   : > { %p1730_p8 = pneg %p1729_p5 }
 0x48d   : > { %p1735_p9 = pnand %p1734_p3, %p1730_p8 }
 0x48f   : > { %1738 = shalt.err (!%p1735_p9)
}
 0x490   : > { %1506 = dma.vmem_to_hbm [thread:$0]  (%p2351_p11), %s1229_s29, 16, %s1226_s21, %s1216_s2  }
 0x491 PF: > { %s2352_s25 = sld [smem:[#allocation15_spill]]  ;;  %p1526_p13 = scmp.ge.s32.totalorder %s1841_s23, 2 }
 0x492   : > { %s2353_s12 = sld [smem:[#allocation20_spill]] }
 0x497   : > { %s1240_s5 = sand.u32 1, %s2352_s25  }
 0x498   : > { %p2354_p4 = scmp.ne.s32.totalorder %s2353_s12, 0  ;;  %s1241_s11 = scalar_lea.sflag [#allocation6], %s1240_s5 }
 0x49a   : > { %p1520_p6 = pnand %p1526_p13, %p2354_p4 }
 0x49c   : > { %p1521_p10 = pneg %p1520_p6 }
 0x49e   : > { %1796 = dma.done.wait (%p1521_p10), %s1241_s11, 16  }
 0x49f   : > { %1798 = vsyncadd (%p1521_p10), %s1241_s11, 4294967280  ;;  %s33_s23 = sadd.s32 1, %s1841_s23   ;;  %s2355_s24 = sld [smem:[#allocation23_spill]] }
 0x4a0   : > { %p30_p12 = scmp.ge.s32.totalorder %s33_s23, 8   ;;  %s2356_s19 = sld [smem:[#allocation17_spill]] }
 0x4a1   : > { %s2357_s20 = sld [smem:[#allocation18_spill]]  ;;  %s2360_s29 = smov %s1805_s30 }
 0x4a2   : > { %s2358_s21 = sld [smem:[#allocation21_spill]]  ;;  %s2361_s30 = smov %s1809_s15 }
 0x4a3   : > { %s2359_s22 = sld [smem:[#allocation22_spill]]  ;;  %s2362_s15 = smov %s2066_s6 }
 0x4a4   : > { %s2363_s16 = smov %s1817_s17  ;;  %s2364_s17 = smov %s1821_s18 }
 0x4a5   : > { %s2365_s18 = smov %s2355_s24  ;;  %32 = sbr.rel (!%p30_p12) target bundleno = 26 (0x1a), region = 148 }
 0x4aa   :  { %1245 = vsyncpa [#allocation5], 1 }
 0x4ab   :  { %1247 = vsyncpa [#allocation5 + $0x1], 1 }
 0x4ac   :  { %1248 = vsyncpa [#allocation8], 1 }
 0x4ad   :  { %1250 = vsyncpa [#allocation8 + $0x1], 1 }
 0x4ae   :  { %1251 = vsyncpa [#allocation6], 1 }
 0x4af   :  { %1253 = vsyncpa [#allocation6 + $0x1], 1 }

</bundles_post_ra>
